<compile_context>
chip_gen: v7x
topology: tpu7x:2x2x1
jax: 0.10.0
libtpu: 0.0.40
codegen_flags: <defaults>
</compile_context>

<pallas_src>
import jax
import jax.numpy as jnp
from jax.experimental import pallas as pl
from jax.experimental.pallas import tpu as pltpu

LANE = 128


def _round_up(n, m):
    return ((n + m - 1) // m) * m


def _cdiv(a, b):
    return -(-a // b)


def mlp_kernel(x_ref, w1_ref, b1_ref, w2_ref, b2_ref,
               w3_ref, b3_ref, w4_ref, b4_ref, o_ref):
    # encode() is already folded into (w1, b1) by the wrapper.
    def dense(h, w_ref, b_ref):
        # bf16 operands into the MXU, f32 accumulation, f32 bias add.
        return jnp.dot(h.astype(jnp.bfloat16), w_ref[...],
                       preferred_element_type=jnp.float32) + b_ref[...]

    def sigmoid(z):
        # single EUP push (tanh) instead of exp + divide
        return 0.5 * jnp.tanh(0.5 * z) + 0.5

    h = sigmoid(dense(x_ref[...], w1_ref, b1_ref))
    h = sigmoid(dense(h, w2_ref, b2_ref))
    h = sigmoid(dense(h, w3_ref, b3_ref))
    y = dense(h, w4_ref, b4_ref)
    # Store only the real D_out columns (lane-padded columns never reach HBM).
    o_ref[...] = y[:, :o_ref.shape[1]].astype(o_ref.dtype)


def _choose_batch_tile(B, tb):
    """Balanced batch tiles; >=2 grid steps for large single-tile batches (v7x)."""
    if B <= 8:
        return 8
    n_steps = max(1, _cdiv(B, tb))
    if n_steps == 1 and B >= 256:
        # Large batch that fits in one tile: split so both v7x TensorCores
        # get work via the "parallel" batch axis (free on v5e/v6e).
        n_steps = 2
    return _round_up(_cdiv(B, n_steps), 8)


def mlp_forward(x, xmin, xmax, params, *, tb=2048):
    """x: [B, D_in] f32.  xmin/xmax: [1, D_in].  params: dict of w1..b4
    (weights [in, out], biases [1, out])."""
    B, D_in = x.shape
    D_out = params["w4"].shape[1]

    # ---- fold encode(x) = x*s + c into layer 1 (in f32, before bf16 cast) ---
    s = 1.0 / (xmax - xmin)                    # [1, D_in]
    c = -xmin * s - 0.5                        # [1, D_in]
    w1 = params["w1"] * s.reshape(D_in, 1)     # diag(s) @ W1
    b1 = c @ params["w1"] + params["b1"]       # [1, H1]

    # ---- zero-pad layer widths to 128 lanes; weights bf16, biases f32 -------
    def pad2(a, rows, cols, dtype):
        a = jnp.pad(a, ((0, rows - a.shape[0]), (0, cols - a.shape[1])))
        return a.astype(dtype)

    H1 = params["w1"].shape[1]
    H2 = params["w2"].shape[1]
    H3 = params["w3"].shape[1]
    H1p, H2p, H3p, Dop = (_round_up(d, LANE) for d in (H1, H2, H3, D_out))

    w1p = pad2(w1,           D_in, H1p, jnp.bfloat16)
    b1p = pad2(b1,           1,    H1p, jnp.float32)
    w2p = pad2(params["w2"], H1p,  H2p, jnp.bfloat16)
    b2p = pad2(params["b2"], 1,    H2p, jnp.float32)
    w3p = pad2(params["w3"], H2p,  H3p, jnp.bfloat16)
    b3p = pad2(params["b3"], 1,    H3p, jnp.float32)
    w4p = pad2(params["w4"], H3p,  Dop, jnp.bfloat16)
    b4p = pad2(params["b4"], 1,    Dop, jnp.float32)

    # ---- batch tiling: big, balanced tiles; pad ragged batches ---------------
    tb_eff = _choose_batch_tile(B, tb)
    Bp = _round_up(B, tb_eff)
    xp = jnp.pad(x, ((0, Bp - B), (0, 0)))

    def const(shape):
        # parameters are resident: same block every grid step
        return pl.BlockSpec(shape, lambda i: (0, 0))

    in_specs = [
        pl.BlockSpec((tb_eff, D_in), lambda i: (i, 0)),   # x (batch-tiled)
        const(w1p.shape), const(b1p.shape),
        const(w2p.shape), const(b2p.shape),
        const(w3p.shape), const(b3p.shape),
        const(w4p.shape), const(b4p.shape),
    ]
    # Narrow (un-padded) output: last dim == full array dim, so this is legal
    # even though D_out is not a multiple of 128.
    out_spec = pl.BlockSpec((tb_eff, D_out), lambda i: (i, 0))

    # TODO(synk): if an xprof trace on v5e shows the output DMA exposed at
    # large tb, add pipeline_mode=pl.Buffered(3) to out_spec.
    y_pad = pl.pallas_call(
        mlp_kernel,
        out_shape=jax.ShapeDtypeStruct((Bp, D_out), jnp.float32),
        grid=(Bp // tb_eff,),
        in_specs=in_specs,
        out_specs=out_spec,
        compiler_params=pltpu.CompilerParams(
            dimension_semantics=("parallel",)),
    )(xp, w1p, b1p, w2p, b2p, w3p, b3p, w4p, b4p)

    return y_pad[:B] if Bp != B else y_pad


def init_params(key, D_in, H1, H2, H3, D_out):
    """Deterministic synthetic init (uniform, a la PyTorch's default Linear init)."""
    sizes = [(D_in, H1), (H1, H2), (H2, H3), (H3, D_out)]
    params = {}
    for idx, (fan_in, fan_out) in enumerate(sizes, start=1):
        key, kw, kb = jax.random.split(key, 3)
        bound = 1.0 / (fan_in ** 0.5)
        params[f"w{idx}"] = jax.random.uniform(
            kw, (fan_in, fan_out), jnp.float32, -bound, bound)
        params[f"b{idx}"] = jax.random.uniform(
            kb, (1, fan_out), jnp.float32, -bound, bound)
    return params


def mlp_reference(x, xmin, xmax, params):
    """Plain-JAX f32 reference mirroring the PyTorch module."""
    h = (x - xmin) / (xmax - xmin) - 0.5
    h = jax.nn.sigmoid(h @ params["w1"] + params["b1"])
    h = jax.nn.sigmoid(h @ params["w2"] + params["b2"])
    h = jax.nn.sigmoid(h @ params["w3"] + params["b3"])
    return h @ params["w4"] + params["b4"]


if __name__ == "__main__":
    # Small shapes consistent with the module: D_in=4, H1=H2=32, H3=16, D_out=3
    B, D_in, H1, H2, H3, D_out = 16, 4, 32, 32, 16, 3

    key = jax.random.PRNGKey(0)
    key, kx = jax.random.split(key)
    x = jax.random.uniform(kx, (B, D_in), jnp.float32, 0.0, 10.0)

    # scalar normalization bounds of the original module, broadcast as [1, D_in]
    xmin = jnp.full((1, D_in), 0.0, jnp.float32)
    xmax = jnp.full((1, D_in), 10.0, jnp.float32)

    params = init_params(key, D_in, H1, H2, H3, D_out)

    y = mlp_forward(x, xmin, xmax, params)
    y = jax.block_until_ready(y)

    y_ref = mlp_reference(x, xmin, xmax, params)
    assert y.shape == (B, D_out)
    # bf16 matmul operands with f32 accumulation -> relaxed tolerance vs the
    # pure-f32 reference.
    assert jnp.allclose(y, y_ref, atol=2e-2, rtol=2e-2), "mismatch vs reference"

    print("KERNEL_OK")
</pallas_src>

<mosaic_0001>
module attributes {stable_mosaic.version = 11 : i64} {
  func.func @mlp_kernel(%arg0: i32, %arg1: memref<16x4xf32, #tpu.memory_space<vmem>>, %arg2: memref<4x128xbf16, #tpu.memory_space<vmem>>, %arg3: memref<1x128xf32, #tpu.memory_space<vmem>>, %arg4: memref<128x128xbf16, #tpu.memory_space<vmem>>, %arg5: memref<1x128xf32, #tpu.memory_space<vmem>>, %arg6: memref<128x128xbf16, #tpu.memory_space<vmem>>, %arg7: memref<1x128xf32, #tpu.memory_space<vmem>>, %arg8: memref<128x128xbf16, #tpu.memory_space<vmem>>, %arg9: memref<1x128xf32, #tpu.memory_space<vmem>>, %arg10: memref<16x3xf32, #tpu.memory_space<vmem>>) attributes {dimension_semantics = [#tpu.dimension_semantics<parallel>], iteration_bounds = array<i64: 1>, scalar_prefetch = 0 : i64, scratch_operands = 0 : i64, tpu.core_type = #tpu.core_type<tc>, window_params = [{transform_indices = @transform_0, window_bounds = array<i64: 16, 4>}, {pipeline_mode = #tpu.pipeline_mode<synchronous>, transform_indices = @transform_1, window_bounds = array<i64: 4, 128>}, {pipeline_mode = #tpu.pipeline_mode<synchronous>, transform_indices = @transform_2, window_bounds = array<i64: 1, 128>}, {pipeline_mode = #tpu.pipeline_mode<synchronous>, transform_indices = @transform_3, window_bounds = array<i64: 128, 128>}, {pipeline_mode = #tpu.pipeline_mode<synchronous>, transform_indices = @transform_4, window_bounds = array<i64: 1, 128>}, {pipeline_mode = #tpu.pipeline_mode<synchronous>, transform_indices = @transform_5, window_bounds = array<i64: 128, 128>}, {pipeline_mode = #tpu.pipeline_mode<synchronous>, transform_indices = @transform_6, window_bounds = array<i64: 1, 128>}, {pipeline_mode = #tpu.pipeline_mode<synchronous>, transform_indices = @transform_7, window_bounds = array<i64: 128, 128>}, {pipeline_mode = #tpu.pipeline_mode<synchronous>, transform_indices = @transform_8, window_bounds = array<i64: 1, 128>}, {transform_indices = @transform_9, window_bounds = array<i64: 16, 3>}]} {
    %c0 = arith.constant 0 : index
    %c0_0 = arith.constant 0 : index
    %0 = vector.load %arg1[%c0, %c0_0] : memref<16x4xf32, #tpu.memory_space<vmem>>, vector<16x4xf32>
    %1 = arith.truncf %0 : vector<16x4xf32> to vector<16x4xbf16>
    %c0_1 = arith.constant 0 : index
    %c0_2 = arith.constant 0 : index
    %2 = vector.load %arg2[%c0_1, %c0_2] : memref<4x128xbf16, #tpu.memory_space<vmem>>, vector<4x128xbf16>
    %cst = arith.constant dense<0.000000e+00> : vector<16x128xf32>
    %3 = tpu.matmul %1, %2, %cst {dimension_numbers = #tpu.dot_dimension_numbers<[1], [0], [0], [1], [0, 0, 1, 1], [], []>} : vector<16x4xbf16>, vector<4x128xbf16>, vector<16x128xf32> -> vector<16x128xf32>
    %c0_3 = arith.constant 0 : index
    %c0_4 = arith.constant 0 : index
    %4 = vector.load %arg3[%c0_3, %c0_4] : memref<1x128xf32, #tpu.memory_space<vmem>>, vector<1x128xf32>
    %5 = vector.broadcast %4 : vector<1x128xf32> to vector<16x128xf32>
    %6 = arith.addf %3, %5 : vector<16x128xf32>
    %cst_5 = arith.constant 5.000000e-01 : f32
    %7 = vector.broadcast %cst_5 : f32 to vector<16x128xf32>
    %8 = arith.mulf %7, %6 : vector<16x128xf32>
    %9 = math.tanh %8 : vector<16x128xf32>
    %cst_6 = arith.constant 5.000000e-01 : f32
    %10 = vector.broadcast %cst_6 : f32 to vector<16x128xf32>
    %11 = arith.mulf %10, %9 : vector<16x128xf32>
    %cst_7 = arith.constant 5.000000e-01 : f32
    %12 = vector.broadcast %cst_7 : f32 to vector<16x128xf32>
    %13 = arith.addf %11, %12 : vector<16x128xf32>
    %14 = arith.truncf %13 : vector<16x128xf32> to vector<16x128xbf16>
    %c0_8 = arith.constant 0 : index
    %c0_9 = arith.constant 0 : index
    %15 = vector.load %arg4[%c0_8, %c0_9] : memref<128x128xbf16, #tpu.memory_space<vmem>>, vector<128x128xbf16>
    %cst_10 = arith.constant dense<0.000000e+00> : vector<16x128xf32>
    %16 = tpu.matmul %14, %15, %cst_10 {dimension_numbers = #tpu.dot_dimension_numbers<[1], [0], [0], [1], [0, 0, 1, 1], [], []>} : vector<16x128xbf16>, vector<128x128xbf16>, vector<16x128xf32> -> vector<16x128xf32>
    %c0_11 = arith.constant 0 : index
    %c0_12 = arith.constant 0 : index
    %17 = vector.load %arg5[%c0_11, %c0_12] : memref<1x128xf32, #tpu.memory_space<vmem>>, vector<1x128xf32>
    %18 = vector.broadcast %17 : vector<1x128xf32> to vector<16x128xf32>
    %19 = arith.addf %16, %18 : vector<16x128xf32>
    %cst_13 = arith.constant 5.000000e-01 : f32
    %20 = vector.broadcast %cst_13 : f32 to vector<16x128xf32>
    %21 = arith.mulf %20, %19 : vector<16x128xf32>
    %22 = math.tanh %21 : vector<16x128xf32>
    %cst_14 = arith.constant 5.000000e-01 : f32
    %23 = vector.broadcast %cst_14 : f32 to vector<16x128xf32>
    %24 = arith.mulf %23, %22 : vector<16x128xf32>
    %cst_15 = arith.constant 5.000000e-01 : f32
    %25 = vector.broadcast %cst_15 : f32 to vector<16x128xf32>
    %26 = arith.addf %24, %25 : vector<16x128xf32>
    %27 = arith.truncf %26 : vector<16x128xf32> to vector<16x128xbf16>
    %c0_16 = arith.constant 0 : index
    %c0_17 = arith.constant 0 : index
    %28 = vector.load %arg6[%c0_16, %c0_17] : memref<128x128xbf16, #tpu.memory_space<vmem>>, vector<128x128xbf16>
    %cst_18 = arith.constant dense<0.000000e+00> : vector<16x128xf32>
    %29 = tpu.matmul %27, %28, %cst_18 {dimension_numbers = #tpu.dot_dimension_numbers<[1], [0], [0], [1], [0, 0, 1, 1], [], []>} : vector<16x128xbf16>, vector<128x128xbf16>, vector<16x128xf32> -> vector<16x128xf32>
    %c0_19 = arith.constant 0 : index
    %c0_20 = arith.constant 0 : index
    %30 = vector.load %arg7[%c0_19, %c0_20] : memref<1x128xf32, #tpu.memory_space<vmem>>, vector<1x128xf32>
    %31 = vector.broadcast %30 : vector<1x128xf32> to vector<16x128xf32>
    %32 = arith.addf %29, %31 : vector<16x128xf32>
    %cst_21 = arith.constant 5.000000e-01 : f32
    %33 = vector.broadcast %cst_21 : f32 to vector<16x128xf32>
    %34 = arith.mulf %33, %32 : vector<16x128xf32>
    %35 = math.tanh %34 : vector<16x128xf32>
    %cst_22 = arith.constant 5.000000e-01 : f32
    %36 = vector.broadcast %cst_22 : f32 to vector<16x128xf32>
    %37 = arith.mulf %36, %35 : vector<16x128xf32>
    %cst_23 = arith.constant 5.000000e-01 : f32
    %38 = vector.broadcast %cst_23 : f32 to vector<16x128xf32>
    %39 = arith.addf %37, %38 : vector<16x128xf32>
    %40 = arith.truncf %39 : vector<16x128xf32> to vector<16x128xbf16>
    %c0_24 = arith.constant 0 : index
    %c0_25 = arith.constant 0 : index
    %41 = vector.load %arg8[%c0_24, %c0_25] : memref<128x128xbf16, #tpu.memory_space<vmem>>, vector<128x128xbf16>
    %cst_26 = arith.constant dense<0.000000e+00> : vector<16x128xf32>
    %42 = tpu.matmul %40, %41, %cst_26 {dimension_numbers = #tpu.dot_dimension_numbers<[1], [0], [0], [1], [0, 0, 1, 1], [], []>} : vector<16x128xbf16>, vector<128x128xbf16>, vector<16x128xf32> -> vector<16x128xf32>
    %c0_27 = arith.constant 0 : index
    %c0_28 = arith.constant 0 : index
    %43 = vector.load %arg9[%c0_27, %c0_28] : memref<1x128xf32, #tpu.memory_space<vmem>>, vector<1x128xf32>
    %44 = vector.broadcast %43 : vector<1x128xf32> to vector<16x128xf32>
    %45 = arith.addf %42, %44 : vector<16x128xf32>
    %46 = vector.extract_strided_slice %45 {offsets = [0, 0], sizes = [16, 3], strides = [1, 1]} : vector<16x128xf32> to vector<16x3xf32>
    %c0_29 = arith.constant 0 : index
    %c0_30 = arith.constant 0 : index
    %47 = vector.load %arg10[%c0_29, %c0_30] : memref<16x3xf32, #tpu.memory_space<vmem>>, vector<16x3xf32>
    tpu.vector_store %arg10[%c0_29, %c0_30], %46 {strides = array<i32>} : memref<16x3xf32, #tpu.memory_space<vmem>>, vector<16x3xf32>,
    return
  }
  func.func @transform_0(%arg0: i32) -> (i32, i32) {
    %c0_i32 = arith.constant 0 : i32
    %c0_i32_0 = arith.constant 0 : i32
    return %arg0, %c0_i32 : i32, i32
  }
  func.func @transform_1(%arg0: i32) -> (i32, i32) {
    %c0_i32 = arith.constant 0 : i32
    %c0_i32_0 = arith.constant 0 : i32
    %c0_i32_1 = arith.constant 0 : i32
    return %c0_i32, %c0_i32_0 : i32, i32
  }
  func.func @transform_2(%arg0: i32) -> (i32, i32) {
    %c0_i32 = arith.constant 0 : i32
    %c0_i32_0 = arith.constant 0 : i32
    %c0_i32_1 = arith.constant 0 : i32
    return %c0_i32, %c0_i32_0 : i32, i32
  }
  func.func @transform_3(%arg0: i32) -> (i32, i32) {
    %c0_i32 = arith.constant 0 : i32
    %c0_i32_0 = arith.constant 0 : i32
    %c0_i32_1 = arith.constant 0 : i32
    return %c0_i32, %c0_i32_0 : i32, i32
  }
  func.func @transform_4(%arg0: i32) -> (i32, i32) {
    %c0_i32 = arith.constant 0 : i32
    %c0_i32_0 = arith.constant 0 : i32
    %c0_i32_1 = arith.constant 0 : i32
    return %c0_i32, %c0_i32_0 : i32, i32
  }
  func.func @transform_5(%arg0: i32) -> (i32, i32) {
    %c0_i32 = arith.constant 0 : i32
    %c0_i32_0 = arith.constant 0 : i32
    %c0_i32_1 = arith.constant 0 : i32
    return %c0_i32, %c0_i32_0 : i32, i32
  }
  func.func @transform_6(%arg0: i32) -> (i32, i32) {
    %c0_i32 = arith.constant 0 : i32
    %c0_i32_0 = arith.constant 0 : i32
    %c0_i32_1 = arith.constant 0 : i32
    return %c0_i32, %c0_i32_0 : i32, i32
  }
  func.func @transform_7(%arg0: i32) -> (i32, i32) {
    %c0_i32 = arith.constant 0 : i32
    %c0_i32_0 = arith.constant 0 : i32
    %c0_i32_1 = arith.constant 0 : i32
    return %c0_i32, %c0_i32_0 : i32, i32
  }
  func.func @transform_8(%arg0: i32) -> (i32, i32) {
    %c0_i32 = arith.constant 0 : i32
    %c0_i32_0 = arith.constant 0 : i32
    %c0_i32_1 = arith.constant 0 : i32
    return %c0_i32, %c0_i32_0 : i32, i32
  }
  func.func @transform_9(%arg0: i32) -> (i32, i32) {
    %c0_i32 = arith.constant 0 : i32
    %c0_i32_0 = arith.constant 0 : i32
    return %arg0, %c0_i32 : i32, i32
  }
}

</mosaic_0001>

<bundles_post_ra>
// kernel: tpu_custom_call.1
= control target key start
LH: loop header
LB: loop body
LE: loop exit
PB: predicated region body
PF: predicated region fallthrough
CT: control target
= control target key end

     0   :  { %14 = vsyncpa [#allocation3], 0  ;;  %s912_s0 = inlined_call_operand.vmem [shape: f32[16,4], index: 0, kind: input, shape index: {}]   ;;  %s913_s1 = inlined_call_operand.vmem [shape: bf16[4,128], index: 1, kind: input, shape index: {}]   ;;  %s914_s2 = inlined_call_operand.vmem [shape: f32[1,128], index: 2, kind: input, shape index: {}]   ;;  %s915_s3 = inlined_call_operand.hbm [shape: bf16[128,128], index: 3, kind: input, shape index: {}]   ;;  %s916_s4 = inlined_call_operand.vmem [shape: f32[1,128], index: 4, kind: input, shape index: {}]   ;;  %s917_s5 = inlined_call_operand.hbm [shape: bf16[128,128], index: 5, kind: input, shape index: {}]   ;;  %s918_s6 = inlined_call_operand.vmem [shape: f32[1,128], index: 6, kind: input, shape index: {}]   ;;  %s919_s7 = inlined_call_operand.hbm [shape: bf16[128,128], index: 7, kind: input, shape index: {}]   ;;  %s920_s8 = inlined_call_operand.vmem [shape: f32[1,128], index: 8, kind: input, shape index: {}]   ;;  %s921_s9 = inlined_call_operand.vmem [shape: f32[16,3], index: 9, kind: output, shape index: {}]  }
   0x1   :  { %15 = vsyncpa [#allocation5], 0  ;;  %s743_s30 = smov [#allocation4]   ;;  %s744_s11 = smov [#allocation2]  }
   0x2   :  { %s41_s10 = sshll.u32 %s743_s30, 4  ;;  %s27_s12 = sshll.u32 %s744_s11, 4  ;;  %s42_s10 = int_to_ptr.vmem [resolvable:$true] %s41_s10  ;;  %s800_s12 = int_to_ptr.vmem [resolvable:$true] %s27_s12 }
   0x3   :  { %s673_s15 = scalar_lea.hbm %s917_s5, 1024 }
   0x4   :  { %p674_p0 = scmp.ne.s32.totalorder %s917_s5, %s673_s15  ;;  %p677_p1 = scmp.lt.u32.totalorder %s673_s15, %s917_s5 }
   0x6   :  { %p679_p2 = pnand %p677_p1, %p674_p0 }
   0x8   :  { %682 = shalt.err (!%p679_p2)
}
   0x9   :  { %s683_s20 = scalar_lea.vmem %s42_s10, 1024  ;;  %p688_p4 = scmp.lt.s32.totalorder %s42_s10, %s42_s10 }
   0xa   :  { %p684_p3 = scmp.ne.s32.totalorder %s42_s10, %s683_s20  ;;  %p689_p5 = scmp.lt.s32.totalorder %s683_s20, %s683_s20 }
   0xc   :  { %p690_p6 = por %p689_p5, %p688_p4 }
   0xe   :  { %p691_p7 = pnand %p690_p6, %p684_p3 }
  0x10   :  { %694 = shalt.err (!%p691_p7)
}
  0x11   :  { %s745_s21 = smov 64   ;;  %s746_s22 = smov 4  }
  0x12   :  { %47 = dma.hbm_to_vmem [thread:$0]  %s917_s5, 1024, %s42_s10, [#allocation5], %s745_s21, %s745_s21, %s746_s22  }
  0x13   :  { %s695_s27 = scalar_lea.hbm %s915_s3, 1024 }
  0x14   :  { %p696_p8 = scmp.ne.s32.totalorder %s915_s3, %s695_s27  ;;  %p699_p9 = scmp.lt.u32.totalorder %s695_s27, %s915_s3 }
  0x16   :  { %p701_p10 = pnand %p699_p9, %p696_p8 }
  0x18   :  { %704 = shalt.err (!%p701_p10)
}
  0x19   :  { %s705_s13 = scalar_lea.vmem %s800_s12, 1024  ;;  %p710_p12 = scmp.lt.s32.totalorder %s800_s12, %s800_s12 }
  0x1a   :  { %p706_p11 = scmp.ne.s32.totalorder %s800_s12, %s705_s13  ;;  %p711_p13 = scmp.lt.s32.totalorder %s705_s13, %s705_s13 }
  0x1c   :  { %p712_p0 = por %p711_p13, %p710_p12 }
  0x1e   :  { %p713_p1 = pnand %p712_p0, %p706_p11 }
  0x20   :  { %716 = shalt.err (!%p713_p1)
}
  0x21   :  { %33 = dma.hbm_to_vmem [thread:$0]  %s915_s3, 1024, %s800_s12, [#allocation3], %s745_s21, %s745_s21, %s746_s22  }
  0x22   :  { %s747_s14 = smov [#allocation6]   ;;  %s717_s18 = scalar_lea.hbm %s919_s7, 1024 }
  0x23   :  { %s55_s15 = sshll.u32 %s747_s14, 4  ;;  %p718_p2 = scmp.ne.s32.totalorder %s919_s7, %s717_s18  ;;  %s56_s15 = int_to_ptr.vmem [resolvable:$true] %s55_s15 }
  0x24   :  { %p721_p3 = scmp.lt.u32.totalorder %s717_s18, %s919_s7 }
  0x26   :  { %p723_p4 = pnand %p721_p3, %p718_p2 }
  0x28   :  { %726 = shalt.err (!%p723_p4)
}
  0x29   :  { %s727_s25 = scalar_lea.vmem %s56_s15, 1024  ;;  %p732_p6 = scmp.lt.s32.totalorder %s56_s15, %s56_s15 }
  0x2a   :  { %p728_p5 = scmp.ne.s32.totalorder %s56_s15, %s727_s25  ;;  %p733_p7 = scmp.lt.s32.totalorder %s727_s25, %s727_s25 }
  0x2c   :  { %p734_p8 = por %p733_p7, %p732_p6 }
  0x2e   :  { %p735_p9 = pnand %p734_p8, %p728_p5 }
  0x30   :  { %738 = shalt.err (!%p735_p9)
}
  0x31   :  { %61 = dma.hbm_to_vmem [thread:$0]  %s919_s7, 1024, %s56_s15, [#allocation5], %s745_s21, %s745_s21, %s746_s22  }
  0x32   :  { %739 = dma.done.wait [#allocation3], 1024  }
  0x33   :  { %740 = vsyncadd [#allocation3], 4294966272 }
  0x34   :  { %741 = dma.done.wait [#allocation5], 2048  }
  0x35   :  { %742 = vsyncadd [#allocation5], 4294965248  ;;  %v748_v0 = vmov 0.0   ;;  %vm749_vm0 = vmmov 0   ;;  %vm89_vm1 = vcmask 1041408   ;;  %v74_v2 = vld [vmem:[%s912_s0] sm:$0xff] }
  0x36   :  { %564 = vmatprep.subr.bf16.mxu0 %v748_v0  ;;  %566 = vmatprep.mubr.msk.bf16.mxu0 %vm749_vm0, %v748_v0  ;;  %v77_v1 = vld [vmem:[%s913_s1] sm:$0x3]  ;;  %v75_v3 = vld [vmem:[%s912_s0 + $0x8] sm:$0xff]  ;;  %vm85_vm2 = vcmask 31744   ;;  %v639_v8 = vld [vmem:[#allocation2 + $0x10] sm:$0xff]   ;;  %vm497_vm3 = vcmask 23552  }
  0x37   :  { %570 = vmatprep.subr.bf16.mxu1 %v748_v0  ;;  %586 = vmatprep.mubr.msk.bf16.mxu1 %vm749_vm0, %v748_v0  ;;  %v91_v4 = vsel %vm89_vm1, %v77_v1, 0  ;;  %v76_v5 = vpack.c.bf16 %v75_v3, %v74_v2  ;;  %v637_v6 = vld [vmem:[#allocation2] sm:$0xff]   ;;  %v638_v7 = vld [vmem:[#allocation2 + $0x8] sm:$0xff]   ;;  %v640_v9 = vld [vmem:[#allocation2 + $0x18] sm:$0xff]  }
  0x38   :  { %565 = vmatpush3.bf16.msra.mxu0 %v91_v4  ;;  %571 = vmatpush3.bf16.msra.mxu1 %v637_v6  ;;  %v641_v10 = vld [vmem:[#allocation2 + $0x20] sm:$0xff]   ;;  %v642_v11 = vld [vmem:[#allocation2 + $0x28] sm:$0xff]   ;;  %v643_v12 = vld [vmem:[#allocation2 + $0x30] sm:$0xff]  }
  0x39   :  { %590 = vmatprep.subr.bf16.mxu0 %v748_v0  ;;  %572 = vmatprep.subr.bf16.mxu1 %v748_v0  ;;  %v644_v13 = vld [vmem:[#allocation2 + $0x38] sm:$0xff]   ;;  %v645_v14 = vld [vmem:[#allocation4] sm:$0xff]   ;;  %v646_v15 = vld [vmem:[#allocation4 + $0x8] sm:$0xff]  }
  0x3a   :  { %v506_v16 = vld [vmem:[%s914_s2] ss:$0 sm:$0xff]  ;;  %v647_v32 = vld [vmem:[#allocation4 + $0x10] sm:$0xff]   ;;  %v648_v33 = vld [vmem:[#allocation4 + $0x18] sm:$0xff]  }
  0x3b   :  { %567 = vmatmul.mubr.msk.bf16.vlgmr.msra.gmra.mrb[0].mxu0 %vm85_vm2, %v76_v5  ;;  %v649_v34 = vld [vmem:[#allocation4 + $0x20] sm:$0xff]   ;;  %v650_v35 = vld [vmem:[#allocation4 + $0x28] sm:$0xff]   ;;  %v651_v36 = vld [vmem:[#allocation4 + $0x30] sm:$0xff]  }
  0x3c   :  { %606 = vmatprep.mubr.msk.bf16.mxu0 %vm749_vm0, %v748_v0  ;;  %573 = vmatpush3.bf16.msra.mxu1 %v638_v7  ;;  %v652_v37 = vld [vmem:[#allocation4 + $0x38] sm:$0xff]   ;;  %v653_v38 = vld [vmem:[#allocation6] sm:$0xff]   ;;  %v654_v39 = vld [vmem:[#allocation6 + $0x8] sm:$0xff]  }
  0x3d   :  { %574 = vmatprep.subr.bf16.mxu1 %v748_v0  ;;  %591 = vmatpush3.bf16.msra.mxu0 %v645_v14  ;;  %v508_v40 = vld [vmem:[%s916_s4] ss:$0 sm:$0xff]  ;;  %v655_v56 = vld [vmem:[#allocation6 + $0x10] sm:$0xff]   ;;  %v656_v57 = vld [vmem:[#allocation6 + $0x18] sm:$0xff]  }
  0x3e   :  { %592 = vmatprep.subr.bf16.mxu0 %v748_v0  ;;  %v657_v58 = vld [vmem:[#allocation6 + $0x20] sm:$0xff]   ;;  %v658_v59 = vld [vmem:[#allocation6 + $0x28] sm:$0xff]   ;;  %v659_v60 = vld [vmem:[#allocation6 + $0x30] sm:$0xff]  }
  0x3f   :  { %v660_v61 = vld [vmem:[#allocation6 + $0x38] sm:$0xff]   ;;  %v517_v62 = vld [vmem:[%s918_s6] ss:$0 sm:$0xff] }
  0x40   :  { %575 = vmatpush3.bf16.msra.mxu1 %v639_v8  ;;  %v526_v14 = vld [vmem:[%s920_s8] ss:$0 sm:$0xff] }
  0x41   :  { %576 = vmatprep.subr.bf16.mxu1 %v748_v0  ;;  %593 = vmatpush3.bf16.msra.mxu0 %v646_v15 }
  0x42   :  { %594 = vmatprep.subr.bf16.mxu0 %v748_v0 }
  0x44   :  { %577 = vmatpush3.bf16.msra.mxu1 %v640_v9 }
  0x45   :  { %578 = vmatprep.subr.bf16.mxu1 %v748_v0  ;;  %595 = vmatpush3.bf16.msra.mxu0 %v647_v32 }
  0x46   :  { %596 = vmatprep.subr.bf16.mxu0 %v748_v0 }
  0x48   :  { %579 = vmatpush3.bf16.msra.mxu1 %v641_v10 }
  0x49   :  { %580 = vmatprep.subr.bf16.mxu1 %v748_v0  ;;  %597 = vmatpush3.bf16.msra.mxu0 %v648_v33 }
  0x4a   :  { %598 = vmatprep.subr.bf16.mxu0 %v748_v0 }
  0x4c   :  { %581 = vmatpush3.bf16.msra.mxu1 %v642_v11 }
  0x4d   :  { %582 = vmatprep.subr.bf16.mxu1 %v748_v0  ;;  %599 = vmatpush3.bf16.msra.mxu0 %v649_v34 }
  0x4e   :  { %600 = vmatprep.subr.bf16.mxu0 %v748_v0 }
  0x50   :  { %583 = vmatpush3.bf16.msra.mxu1 %v643_v12 }
  0x51   :  { %584 = vmatprep.subr.bf16.mxu1 %v748_v0  ;;  %601 = vmatpush3.bf16.msra.mxu0 %v650_v35 }
  0x52   :  { %602 = vmatprep.subr.bf16.mxu0 %v748_v0 }
  0x54   :  { %585 = vmatpush3.bf16.msra.mxu1 %v644_v13 }
  0x55   :  { %610 = vmatprep.subr.bf16.mxu1 %v748_v0  ;;  %603 = vmatpush3.bf16.msra.mxu0 %v651_v36 }
  0x56   :  { %604 = vmatprep.subr.bf16.mxu0 %v748_v0 }
  0x59   :  { %605 = vmatpush3.bf16.msra.mxu0 %v652_v37 }
 0x10e   :  { %v127_v17 = vpop.f32.mrb[0].mxu0 }
 0x10f   :  { %v128_v18 = vadd.f32 %v506_v16, %v127_v17  ;;  %v568_v19 = vpop.f32.mrb[1].mxu0 }
 0x110   :  { %v130_v20 = vpop.f32.mrb[2].mxu0 }
 0x111   :  { %v134_v21 = vmul.f32 0.5, %v128_v18  ;;  %v131_v22 = vadd.f32 %v506_v16, %v130_v20  ;;  %v569_v23 = vpop.f32.mrb[3].mxu0 }
 0x113   :  { %661 = vtanh.f32 %v134_v21  ;;  %v135_v24 = vmul.f32 0.5, %v131_v22 }
 0x115   :  { %663 = vtanh.f32 %v135_v24 }
 0x11d   :  { %v662_v25 = vpop.eup %661 }
 0x11e   :  { %v138_v26 = vmul.f32 0.5, %v662_v25 }
 0x11f   :  { %v664_v27 = vpop.eup %663 }
 0x120   :  { %v139_v28 = vmul.f32 0.5, %v664_v27  ;;  %v140_v29 = vadd.f32 0.5, %v138_v26 }
 0x122   :  { %v141_v30 = vadd.f32 0.5, %v139_v28 }
 0x124   :  { %v142_v31 = vpack.c.bf16 %v141_v30, %v140_v29 }
 0x126   :  { %587 = vmatmul.mubr.bf16.vlgmr.msra.gmra.mrb[0].mxu1 %v142_v31 }
 0x127   :  { %626 = vmatprep.mubr.msk.bf16.mxu1 %vm749_vm0, %v748_v0  ;;  %611 = vmatpush3.bf16.msra.mxu1 %v653_v38 }
 0x128   :  { %612 = vmatprep.subr.bf16.mxu1 %v748_v0 }
 0x12b   :  { %613 = vmatpush3.bf16.msra.mxu1 %v654_v39 }
 0x12c   :  { %614 = vmatprep.subr.bf16.mxu1 %v748_v0 }
 0x12f   :  { %615 = vmatpush3.bf16.msra.mxu1 %v655_v56 }
 0x130   :  { %616 = vmatprep.subr.bf16.mxu1 %v748_v0 }
 0x133   :  { %617 = vmatpush3.bf16.msra.mxu1 %v656_v57 }
 0x134   :  { %618 = vmatprep.subr.bf16.mxu1 %v748_v0 }
 0x137   :  { %619 = vmatpush3.bf16.msra.mxu1 %v657_v58 }
 0x138   :  { %620 = vmatprep.subr.bf16.mxu1 %v748_v0 }
 0x13b   :  { %621 = vmatpush3.bf16.msra.mxu1 %v658_v59 }
 0x13c   :  { %622 = vmatprep.subr.bf16.mxu1 %v748_v0 }
 0x13f   :  { %623 = vmatpush3.bf16.msra.mxu1 %v659_v60 }
 0x140   :  { %624 = vmatprep.subr.bf16.mxu1 %v748_v0 }
 0x143   :  { %625 = vmatpush3.bf16.msra.mxu1 %v660_v61 }
 0x1f9   :  { %v248_v41 = vpop.f32.mrb[0].mxu1 }
 0x1fa   :  { %v249_v42 = vadd.f32 %v508_v40, %v248_v41  ;;  %v588_v43 = vpop.f32.mrb[1].mxu1 }
 0x1fb   :  { %v251_v44 = vpop.f32.mrb[2].mxu1 }
 0x1fc   :  { %v255_v45 = vmul.f32 0.5, %v249_v42  ;;  %v252_v46 = vadd.f32 %v508_v40, %v251_v44  ;;  %v589_v47 = vpop.f32.mrb[3].mxu1 }
 0x1fe   :  { %665 = vtanh.f32 %v255_v45  ;;  %v256_v48 = vmul.f32 0.5, %v252_v46 }
 0x200   :  { %667 = vtanh.f32 %v256_v48 }
 0x208   :  { %v666_v49 = vpop.eup %665 }
 0x209   :  { %v259_v50 = vmul.f32 0.5, %v666_v49 }
 0x20a   :  { %v668_v51 = vpop.eup %667 }
 0x20b   :  { %v260_v52 = vmul.f32 0.5, %v668_v51  ;;  %v261_v53 = vadd.f32 0.5, %v259_v50 }
 0x20d   :  { %v262_v54 = vadd.f32 0.5, %v260_v52 }
 0x20f   :  { %v263_v55 = vpack.c.bf16 %v262_v54, %v261_v53 }
 0x211   :  { %607 = vmatmul.mubr.bf16.vlgmr.msra.gmra.mrb[4].mxu0 %v263_v55 }
 0x2e4   :  { %v369_v63 = vpop.f32.mrb[4].mxu0 }
 0x2e5   :  { %v370_v1 = vadd.f32 %v517_v62, %v369_v63  ;;  %v608_v2 = vpop.f32.mrb[5].mxu0 }
 0x2e6   :  { %v372_v3 = vpop.f32.mrb[6].mxu0 }
 0x2e7   :  { %v376_v4 = vmul.f32 0.5, %v370_v1  ;;  %v373_v5 = vadd.f32 %v517_v62, %v372_v3  ;;  %v609_v6 = vpop.f32.mrb[7].mxu0 }
 0x2e9   :  { %669 = vtanh.f32 %v376_v4  ;;  %v377_v7 = vmul.f32 0.5, %v373_v5 }
 0x2eb   :  { %671 = vtanh.f32 %v377_v7 }
 0x2f3   :  { %v670_v8 = vpop.eup %669 }
 0x2f4   :  { %v380_v9 = vmul.f32 0.5, %v670_v8 }
 0x2f5   :  { %v672_v10 = vpop.eup %671 }
 0x2f6   :  { %v381_v0 = vmul.f32 0.5, %v672_v10  ;;  %v382_v11 = vadd.f32 0.5, %v380_v9 }
 0x2f8   :  { %v383_v12 = vadd.f32 0.5, %v381_v0 }
 0x2fa   :  { %v384_v13 = vpack.c.bf16 %v383_v12, %v382_v11 }
 0x2fc   :  { %627 = vmatmul.mubr.bf16.vlgmr.msra.gmra.mrb[4].mxu1 %v384_v13 }
 0x3cf   :  { %v490_v15 = vpop.f32.mrb[4].mxu1 }
 0x3d0   :  { %v491_v16 = vadd.f32 %v526_v14, %v490_v15  ;;  %v628_v17 = vpop.f32.mrb[5].mxu1 }
 0x3d1   :  { %v493_v18 = vpop.f32.mrb[6].mxu1 }
 0x3d2   :  { %498 = vst.msk [vmem:[%s921_s9] sm:$0xff] %vm497_vm3, %v491_v16  ;;  %v494_v19 = vadd.f32 %v526_v14, %v493_v18  ;;  %v629_v20 = vpop.f32.mrb[7].mxu1 }
 0x3d4   :  { %499 = vst.msk [vmem:[%s921_s9 + $0x8] sm:$0xff] %vm497_vm3, %v494_v19 }
 0x3d5   :  { %504 = vsyncpa [#allocation3], 1 }
 0x3d6   :  { %505 = vsyncpa [#allocation5], 1 }

</bundles_post_ra>
